<compile_context>
chip_gen: v5e
topology: v5e:2x2
jax: 0.10.0
libtpu: 0.0.40
codegen_flags: <defaults>
</compile_context>

<pallas_src>
import jax
import jax.numpy as jnp
from jax.experimental import pallas as pl
from jax.experimental.pallas import tpu as pltpu


def decoder1_kernel(x_ref, w1_ref, b1_ref, a1_ref,
                    w2_ref, b2_ref, a2_ref,
                    w3_ref, b3_ref, o_ref):
    x = x_ref[...]                                            # [D, TB] feature-major

    # linear1 + PReLU (single shared slope a1, read from SMEM scalar path)
    h1 = jnp.dot(w1_ref[...], x, preferred_element_type=jnp.float32) + b1_ref[...]
    a1 = a1_ref[0, 0]
    h1 = jnp.where(h1 > 0, h1, a1 * h1)                        # [32, TB]
    # dropout(p=0.0) is the identity (even in train mode with p=0)

    # linear2 + PReLU
    h2 = jnp.dot(w2_ref[...], h1, preferred_element_type=jnp.float32) + b2_ref[...]
    a2 = a2_ref[0, 0]
    h2 = jnp.where(h2 > 0, h2, a2 * h2)                        # [16, TB]

    # linear3 -> lane-dense [1, TB] output
    o_ref[...] = jnp.dot(w3_ref[...], h2, preferred_element_type=jnp.float32) + b3_ref[...]


def decoder1_forward(x, params, max_tile_b=512):
    """x: [B, input_dim] float32.  Returns squeezed output like torch .squeeze()."""
    B, D = x.shape
    w1, b1, a1, w2, b2, a2, w3, b3 = params

    # Batch tile: multiple of 128 (lane width), capped at max_tile_b.
    tb = min(max_tile_b, ((B + 127) // 128) * 128)
    b_pad = ((B + tb - 1) // tb) * tb
    grid = (b_pad // tb,)

    # Feature-major, zero-padded along batch (layout plumbing stays in the wrapper).
    x_t = jnp.pad(x.T, ((0, 0), (0, b_pad - B)))               # [D, b_pad]

    vmem = pltpu.MemorySpace.VMEM
    smem = pltpu.MemorySpace.SMEM
    const2 = lambda i: (0, 0)

    out = pl.pallas_call(
        decoder1_kernel,
        out_shape=jax.ShapeDtypeStruct((1, b_pad), jnp.float32),
        grid=grid,
        in_specs=[
            pl.BlockSpec((D, tb), lambda i: (0, i), memory_space=vmem),   # x^T tile
            pl.BlockSpec((32, D), const2, memory_space=vmem),             # w1 (resident)
            pl.BlockSpec((32, 1), const2, memory_space=vmem),             # b1
            pl.BlockSpec(memory_space=smem),                              # a1 scalar
            pl.BlockSpec((16, 32), const2, memory_space=vmem),            # w2
            pl.BlockSpec((16, 1), const2, memory_space=vmem),             # b2
            pl.BlockSpec(memory_space=smem),                              # a2 scalar
            pl.BlockSpec((1, 16), const2, memory_space=vmem),             # w3
            pl.BlockSpec((1, 1), const2, memory_space=vmem),              # b3
        ],
        out_specs=pl.BlockSpec((1, tb), lambda i: (0, i), memory_space=vmem),
        compiler_params=pltpu.CompilerParams(
            dimension_semantics=("parallel",)),
        cost_estimate=pl.CostEstimate(
            flops=2 * b_pad * (D * 32 + 32 * 16 + 16 * 1),
            transcendentals=0,
            bytes_accessed=4 * (D * b_pad + b_pad + 32 * D + 16 * 32 + 16)),
    )(x_t, w1, b1, a1, w2, b2, a2, w3, b3)

    # torch .squeeze(): drop all size-1 dims of the [B, 1] result
    return jnp.squeeze(out[0, :B])


def init_params(key, input_dim):
    """Deterministic init matching the module's parameter shapes.
    Weights are stored as [out, in]; biases as [out, 1]."""
    k1, k2, k3, k4, k5, k6 = jax.random.split(key, 6)

    def uinit(k, shape, fan_in):
        bound = 1.0 / jnp.sqrt(jnp.float32(fan_in))
        return jax.random.uniform(k, shape, jnp.float32, -bound, bound)

    w1 = uinit(k1, (32, input_dim), input_dim)
    b1 = uinit(k2, (32, 1), input_dim)
    w2 = uinit(k3, (16, 32), 32)
    b2 = uinit(k4, (16, 1), 32)
    w3 = uinit(k5, (1, 16), 16)
    b3 = uinit(k6, (1, 1), 16)
    # PReLU default: single parameter initialized to 0.25
    a1 = jnp.full((1, 1), 0.25, jnp.float32)
    a2 = jnp.full((1, 1), 0.25, jnp.float32)
    return (w1, b1, a1, w2, b2, a2, w3, b3)


def reference_forward(x, params):
    w1, b1, a1, w2, b2, a2, w3, b3 = params
    h1 = x @ w1.T + b1[:, 0]
    h1 = jnp.where(h1 > 0, h1, a1[0, 0] * h1)
    h2 = h1 @ w2.T + b2[:, 0]
    h2 = jnp.where(h2 > 0, h2, a2[0, 0] * h2)
    return jnp.squeeze(h2 @ w3.T + b3[:, 0])


if __name__ == "__main__":
    key = jax.random.PRNGKey(0)
    kx, kp = jax.random.split(key)

    B, input_dim = 8, 16
    x = jax.random.normal(kx, (B, input_dim), jnp.float32)
    params = init_params(kp, input_dim)

    y = decoder1_forward(x, params)
    y = jax.block_until_ready(y)

    y_ref = reference_forward(x, params)
    assert y.shape == (B,), y.shape
    assert jnp.allclose(y, y_ref, atol=1e-5, rtol=1e-5)

    print("KERNEL_OK")
</pallas_src>

<mosaic_0001>
module attributes {stable_mosaic.version = 11 : i64} {
  func.func @decoder1_kernel(%arg0: i32, %arg1: memref<16x128xf32, #tpu.memory_space<vmem>>, %arg2: memref<32x16xf32, #tpu.memory_space<vmem>>, %arg3: memref<32x1xf32, #tpu.memory_space<vmem>>, %arg4: memref<1x1xf32, #tpu.memory_space<smem>>, %arg5: memref<16x32xf32, #tpu.memory_space<vmem>>, %arg6: memref<16x1xf32, #tpu.memory_space<vmem>>, %arg7: memref<1x1xf32, #tpu.memory_space<smem>>, %arg8: memref<1x16xf32, #tpu.memory_space<vmem>>, %arg9: memref<1x1xf32, #tpu.memory_space<vmem>>, %arg10: memref<1x128xf32, #tpu.memory_space<vmem>>) attributes {dimension_semantics = [#tpu.dimension_semantics<parallel>], iteration_bounds = array<i64: 1>, scalar_prefetch = 0 : i64, scratch_operands = 0 : i64, tpu.core_type = #tpu.core_type<tc>, window_params = [{transform_indices = @transform_0, window_bounds = array<i64: 16, 128>}, {pipeline_mode = #tpu.pipeline_mode<synchronous>, transform_indices = @transform_1, window_bounds = array<i64: 32, 16>}, {pipeline_mode = #tpu.pipeline_mode<synchronous>, transform_indices = @transform_2, window_bounds = array<i64: 32, 1>}, {transform_indices = @transform_3, window_bounds = array<i64: 1, 1>}, {pipeline_mode = #tpu.pipeline_mode<synchronous>, transform_indices = @transform_4, window_bounds = array<i64: 16, 32>}, {pipeline_mode = #tpu.pipeline_mode<synchronous>, transform_indices = @transform_5, window_bounds = array<i64: 16, 1>}, {transform_indices = @transform_6, window_bounds = array<i64: 1, 1>}, {pipeline_mode = #tpu.pipeline_mode<synchronous>, transform_indices = @transform_7, window_bounds = array<i64: 1, 16>}, {pipeline_mode = #tpu.pipeline_mode<synchronous>, transform_indices = @transform_8, window_bounds = array<i64: 1, 1>}, {transform_indices = @transform_9, window_bounds = array<i64: 1, 128>}]} {
    %c0 = arith.constant 0 : index
    %c0_0 = arith.constant 0 : index
    %0 = vector.load %arg1[%c0, %c0_0] : memref<16x128xf32, #tpu.memory_space<vmem>>, vector<16x128xf32>
    %c0_1 = arith.constant 0 : index
    %c0_2 = arith.constant 0 : index
    %1 = vector.load %arg2[%c0_1, %c0_2] : memref<32x16xf32, #tpu.memory_space<vmem>>, vector<32x16xf32>
    %cst = arith.constant dense<0.000000e+00> : vector<32x128xf32>
    %2 = tpu.matmul %1, %0, %cst {dimension_numbers = #tpu.dot_dimension_numbers<[1], [0], [0], [1], [0, 0, 1, 1], [], []>} : vector<32x16xf32>, vector<16x128xf32>, vector<32x128xf32> -> vector<32x128xf32>
    %c0_3 = arith.constant 0 : index
    %c0_4 = arith.constant 0 : index
    %3 = vector.load %arg3[%c0_3, %c0_4] : memref<32x1xf32, #tpu.memory_space<vmem>>, vector<32x1xf32>
    %4 = vector.broadcast %3 : vector<32x1xf32> to vector<32x128xf32>
    %5 = arith.addf %2, %4 : vector<32x128xf32>
    %c0_5 = arith.constant 0 : index
    %c0_6 = arith.constant 0 : index
    %6 = memref.load %arg4[%c0_5, %c0_6] : memref<1x1xf32, #tpu.memory_space<smem>>
    %cst_7 = arith.constant 0.000000e+00 : f32
    %7 = vector.broadcast %cst_7 : f32 to vector<32x128xf32>
    %8 = arith.cmpf ogt, %5, %7 : vector<32x128xf32>
    %9 = vector.broadcast %6 : f32 to vector<32x128xf32>
    %10 = arith.mulf %9, %5 : vector<32x128xf32>
    %11 = arith.select %8, %5, %10 : vector<32x128xi1>, vector<32x128xf32>
    %c0_8 = arith.constant 0 : index
    %c0_9 = arith.constant 0 : index
    %12 = vector.load %arg5[%c0_8, %c0_9] : memref<16x32xf32, #tpu.memory_space<vmem>>, vector<16x32xf32>
    %cst_10 = arith.constant dense<0.000000e+00> : vector<16x128xf32>
    %13 = tpu.matmul %12, %11, %cst_10 {dimension_numbers = #tpu.dot_dimension_numbers<[1], [0], [0], [1], [0, 0, 1, 1], [], []>} : vector<16x32xf32>, vector<32x128xf32>, vector<16x128xf32> -> vector<16x128xf32>
    %c0_11 = arith.constant 0 : index
    %c0_12 = arith.constant 0 : index
    %14 = vector.load %arg6[%c0_11, %c0_12] : memref<16x1xf32, #tpu.memory_space<vmem>>, vector<16x1xf32>
    %15 = vector.broadcast %14 : vector<16x1xf32> to vector<16x128xf32>
    %16 = arith.addf %13, %15 : vector<16x128xf32>
    %c0_13 = arith.constant 0 : index
    %c0_14 = arith.constant 0 : index
    %17 = memref.load %arg7[%c0_13, %c0_14] : memref<1x1xf32, #tpu.memory_space<smem>>
    %cst_15 = arith.constant 0.000000e+00 : f32
    %18 = vector.broadcast %cst_15 : f32 to vector<16x128xf32>
    %19 = arith.cmpf ogt, %16, %18 : vector<16x128xf32>
    %20 = vector.broadcast %17 : f32 to vector<16x128xf32>
    %21 = arith.mulf %20, %16 : vector<16x128xf32>
    %22 = arith.select %19, %16, %21 : vector<16x128xi1>, vector<16x128xf32>
    %c0_16 = arith.constant 0 : index
    %c0_17 = arith.constant 0 : index
    %23 = vector.load %arg8[%c0_16, %c0_17] : memref<1x16xf32, #tpu.memory_space<vmem>>, vector<1x16xf32>
    %cst_18 = arith.constant dense<0.000000e+00> : vector<1x128xf32>
    %24 = tpu.matmul %23, %22, %cst_18 {dimension_numbers = #tpu.dot_dimension_numbers<[1], [0], [0], [1], [0, 0, 1, 1], [], []>} : vector<1x16xf32>, vector<16x128xf32>, vector<1x128xf32> -> vector<1x128xf32>
    %c0_19 = arith.constant 0 : index
    %c0_20 = arith.constant 0 : index
    %25 = vector.load %arg9[%c0_19, %c0_20] : memref<1x1xf32, #tpu.memory_space<vmem>>, vector<1x1xf32>
    %26 = vector.broadcast %25 : vector<1x1xf32> to vector<1x128xf32>
    %27 = arith.addf %24, %26 : vector<1x128xf32>
    %c0_21 = arith.constant 0 : index
    %c0_22 = arith.constant 0 : index
    %28 = vector.load %arg10[%c0_21, %c0_22] : memref<1x128xf32, #tpu.memory_space<vmem>>, vector<1x128xf32>
    tpu.vector_store %arg10[%c0_21, %c0_22], %27 {strides = array<i32>} : memref<1x128xf32, #tpu.memory_space<vmem>>, vector<1x128xf32>,
    return
  }
  func.func @transform_0(%arg0: i32) -> (i32, i32) {
    %c0_i32 = arith.constant 0 : i32
    %c0_i32_0 = arith.constant 0 : i32
    return %c0_i32, %arg0 : i32, i32
  }
  func.func @transform_1(%arg0: i32) -> (i32, i32) {
    %c0_i32 = arith.constant 0 : i32
    %c0_i32_0 = arith.constant 0 : i32
    %c0_i32_1 = arith.constant 0 : i32
    return %c0_i32, %c0_i32_0 : i32, i32
  }
  func.func @transform_2(%arg0: i32) -> (i32, i32) {
    %c0_i32 = arith.constant 0 : i32
    %c0_i32_0 = arith.constant 0 : i32
    %c0_i32_1 = arith.constant 0 : i32
    return %c0_i32, %c0_i32_0 : i32, i32
  }
  func.func @transform_3(%arg0: i32) -> (i32, i32) {
    %c0_i32 = arith.constant 0 : i32
    %c0_i32_0 = arith.constant 0 : i32
    %c0_i32_1 = arith.constant 0 : i32
    return %c0_i32, %c0_i32_0 : i32, i32
  }
  func.func @transform_4(%arg0: i32) -> (i32, i32) {
    %c0_i32 = arith.constant 0 : i32
    %c0_i32_0 = arith.constant 0 : i32
    %c0_i32_1 = arith.constant 0 : i32
    return %c0_i32, %c0_i32_0 : i32, i32
  }
  func.func @transform_5(%arg0: i32) -> (i32, i32) {
    %c0_i32 = arith.constant 0 : i32
    %c0_i32_0 = arith.constant 0 : i32
    %c0_i32_1 = arith.constant 0 : i32
    return %c0_i32, %c0_i32_0 : i32, i32
  }
  func.func @transform_6(%arg0: i32) -> (i32, i32) {
    %c0_i32 = arith.constant 0 : i32
    %c0_i32_0 = arith.constant 0 : i32
    %c0_i32_1 = arith.constant 0 : i32
    return %c0_i32, %c0_i32_0 : i32, i32
  }
  func.func @transform_7(%arg0: i32) -> (i32, i32) {
    %c0_i32 = arith.constant 0 : i32
    %c0_i32_0 = arith.constant 0 : i32
    %c0_i32_1 = arith.constant 0 : i32
    return %c0_i32, %c0_i32_0 : i32, i32
  }
  func.func @transform_8(%arg0: i32) -> (i32, i32) {
    %c0_i32 = arith.constant 0 : i32
    %c0_i32_0 = arith.constant 0 : i32
    %c0_i32_1 = arith.constant 0 : i32
    return %c0_i32, %c0_i32_0 : i32, i32
  }
  func.func @transform_9(%arg0: i32) -> (i32, i32) {
    %c0_i32 = arith.constant 0 : i32
    %c0_i32_0 = arith.constant 0 : i32
    return %c0_i32, %arg0 : i32, i32
  }
}

</mosaic_0001>

<bundles_post_ra>
// kernel: tpu_custom_call.1
= control target key start
LH: loop header
LB: loop body
LE: loop exit
PB: predicated region body
PF: predicated region fallthrough
CT: control target
= control target key end

     0   :  { %s377_s0 = inlined_call_operand.vmem [shape: f32[16,128], index: 0, kind: input, shape index: {}]   ;;  %s378_s1 = inlined_call_operand.vmem [shape: f32[32,16], index: 1, kind: input, shape index: {}]   ;;  %s379_s2 = inlined_call_operand.vmem [shape: f32[32,1], index: 2, kind: input, shape index: {}]   ;;  %s380_s3 = inlined_call_operand.<no memory space> [shape: f32[1,1], index: 3, kind: input, shape index: {}]   ;;  %s381_s4 = inlined_call_operand.vmem [shape: f32[16,32], index: 4, kind: input, shape index: {}]   ;;  %s382_s5 = inlined_call_operand.vmem [shape: f32[16,1], index: 5, kind: input, shape index: {}]   ;;  %s383_s6 = inlined_call_operand.<no memory space> [shape: f32[1,1], index: 6, kind: input, shape index: {}]   ;;  %s384_s7 = inlined_call_operand.vmem [shape: f32[1,16], index: 7, kind: input, shape index: {}]   ;;  %s385_s8 = inlined_call_operand.<no memory space> [shape: f32[1,1], index: 8, kind: input, shape index: {}]   ;;  %s386_s9 = inlined_call_operand.hbm [shape: f32[1,128], index: 9, kind: output, shape index: {}]  }
   0x1   :  { %v16_v0 = vstv %s385_s8 }
   0x2   :  { %17 = vst [vmem:[#allocation4] sm:$0x1] %v16_v0 }
   0x3   :  { %v38_v1 = vld [vmem:[%s377_s0 + $0x8] sm:$0xff]  ;;  %v37_v2 = vld [vmem:[%s377_s0] sm:$0xff]  ;;  %v41_v3 = vld [vmem:[%s378_s1 + $0x10] sm:$0xff]  ;;  %vm67_vm0 = vcmask 130048   ;;  %v263_v5 = vmov 0  }
   0x4   :  { %230 = vmatpush.msra.mxu3 %v38_v1  ;;  %94 = vmatpush.msra.mxu0 %v38_v1  ;;  %v39_v4 = vld [vmem:[%s378_s1] sm:$0xff]  ;;  %v46_v6 = vld [vmem:[%s379_s2 + $0x18] sm:$0xff]  ;;  %v44_v7 = vld [vmem:[%s379_s2 + $0x8] sm:$0xff] }
   0x5   :  { %234 = vset.pattern.permute.xlu0 %v263_v5  ;;  %235 = vset.pattern.permute.xlu1 %v263_v5 }
   0x6   :  { %231 = vmatpush.msra.mxu3 %v37_v2  ;;  %95 = vmatpush.msra.mxu0 %v37_v2 }
   0x7   :  { %18 = vsyncpa [#allocation6], 0  ;;  %225 = vmatmul.msk.f32.vlgmr.msra.gmra.mxu3 %vm67_vm0, %v41_v3  ;;  %223 = vmatmul.msk.f32.vlgmr.msra.gmra.mxu0 %vm67_vm0, %v39_v4  ;;  %v42_v8 = vld [vmem:[%s378_s1 + $0x18] sm:$0xff]  ;;  %v40_v9 = vld [vmem:[%s378_s1 + $0x8] sm:$0xff]  ;;  %v114_v24 = vstv %s380_s3  ;;  %vm137_vm5 = vcmask 261120   ;;  %v170_v43 = vstv %s383_s6  ;;  %s214_s19 = sshll.u32 %s386_s9, 4  ;;  %s215_s19 = int_to_ptr.hbm [resolvable:$true] %s214_s19 }
   0x8   :  { %64 = vperm.xlu0 %234, %v46_v6   ;;  %54 = vperm.xlu1 %235, %v44_v7   ;;  %v45_v10 = vld [vmem:[%s379_s2 + $0x10] sm:$0xff]  ;;  %v43_v11 = vld [vmem:[%s379_s2] sm:$0xff]  ;;  %v126_v15 = vld [vmem:[%s382_s5 + $0x8] sm:$0xff] }
   0x9   :  { %236 = vset.pattern.permute.xlu2 %v263_v5  ;;  %v176_v12 = vld [vmem:[#allocation4] sm:$0x1]  ;;  %v124_v37 = vld [vmem:[%s381_s4 + $0x8] sm:$0xff] }
   0xa   :  { %134 = vperm.xlu2 %236, %v126_v15   ;;  %v125_v18 = vld [vmem:[%s382_s5] sm:$0xff] }
   0xb   :  { %v123_v35 = vld [vmem:[%s381_s4] sm:$0xff]  ;;  %s264_s4 = smov [#allocation5]  }
   0xc   :  { %v175_v48 = vld [vmem:[%s384_s7] sm:$0x1]  ;;  %s212_s18 = sshll.u32 %s264_s4, 4  ;;  %s213_s18 = int_to_ptr.vmem [resolvable:$true] %s212_s18 }
   0xf   :  { %226 = vmatmul.msk.f32.gmra.mxu3 %vm67_vm0, %v42_v8  ;;  %224 = vmatmul.msk.f32.gmra.mxu0 %vm67_vm0, %v40_v9 }
  0x10   :  { %59 = vperm.xlu0 %234, %v45_v10   ;;  %49 = vperm.xlu1 %235, %v43_v11  }
  0x12   :  { %129 = vperm.xlu2 %236, %v125_v18  }
  0x18   :  { %179 = vperm.xlu0 %234, %v176_v12  }
  0x64   :  { %v135_v38 = vpop.permute.xlu2 %134 }
  0x6c   :  { %v130_v40 = vpop.permute.xlu2 %129 }
  0x7a   :  { %v65_v13 = vpop.permute.xlu0 %64  ;;  %v55_v16 = vpop.permute.xlu1 %54 }
  0x82   :  { %v60_v19 = vpop.permute.xlu0 %59  ;;  %v50_v22 = vpop.permute.xlu1 %49 }
  0x84   :  { %v97_v14 = vpop.f32.mrf.mxu0 }
  0x85   :  { %v98_v27 = vadd.f32 %v97_v14, %v50_v22 }
  0x87   :  { %v115_v33 = vmul.f32 %v114_v24, %v98_v27  ;;  %vm110_vm4 = vcmp.gt.f32.partialorder %v98_v27, 0.0 }
  0x89   :  { %v119_v36 = vsel %vm110_vm4, %v98_v27, %v115_v33 }
  0x8a   :  { %v103_v17 = vpop.f32.mrf.mxu3  ;;  %v180_v50 = vpop.permute.xlu0 %179 }
  0x8b   :  { %v104_v21 = vadd.f32 %v103_v17, %v60_v19  ;;  %v182_v51 = vperm.slane %v180_v50, 0 }
  0x8c   :  { %v100_v20 = vpop.f32.mrf.mxu0 }
  0x8d   :  { %v101_v25 = vadd.f32 %v100_v20, %v55_v16  ;;  %v117_v29 = vmul.f32 %v114_v24, %v104_v21  ;;  %vm112_vm2 = vcmp.gt.f32.partialorder %v104_v21, 0.0 }
  0x8f   :  { %v116_v31 = vmul.f32 %v114_v24, %v101_v25  ;;  %vm111_vm3 = vcmp.gt.f32.partialorder %v101_v25, 0.0  ;;  %v121_v32 = vsel %vm112_vm2, %v104_v21, %v117_v29 }
  0x91   :  { %v120_v34 = vsel %vm111_vm3, %v101_v25, %v116_v31 }
  0x92   :  { %v106_v23 = vpop.f32.mrf.mxu3 }
  0x93   :  { %v107_v26 = vadd.f32 %v106_v23, %v65_v13 }
  0x95   :  { %vm113_vm1 = vcmp.gt.f32.partialorder %v107_v26, 0.0  ;;  %v118_v28 = vmul.f32 %v114_v24, %v107_v26 }
  0x97   :  { %v122_v30 = vsel %vm113_vm1, %v107_v26, %v118_v28 }
  0x98   :  { %156 = vmatpush.msra.mxu1 %v122_v30 }
  0x9a   :  { %157 = vmatpush.msra.mxu1 %v121_v32 }
  0x9c   :  { %158 = vmatpush.msra.mxu1 %v120_v34 }
  0x9e   :  { %159 = vmatpush.msra.mxu1 %v119_v36 }
  0x9f   :  { %227 = vmatmul.msk.f32.vlgmr.msra.gmra.mxu1 %vm137_vm5, %v123_v35 }
  0xa7   :  { %228 = vmatmul.msk.f32.gmra.mxu1 %vm137_vm5, %v124_v37 }
 0x11c   :  { %v161_v39 = vpop.f32.mrf.mxu1 }
 0x11d   :  { %v162_v41 = vadd.f32 %v161_v39, %v130_v40 }
 0x11f   :  { %v171_v46 = vmul.f32 %v170_v43, %v162_v41  ;;  %vm168_vm7 = vcmp.gt.f32.partialorder %v162_v41, 0.0 }
 0x121   :  { %v173_v49 = vsel %vm168_vm7, %v162_v41, %v171_v46 }
 0x124   :  { %v164_v42 = vpop.f32.mrf.mxu1 }
 0x125   :  { %v165_v44 = vadd.f32 %v164_v42, %v135_v38 }
 0x127   :  { %vm169_vm6 = vcmp.gt.f32.partialorder %v165_v44, 0.0  ;;  %v172_v45 = vmul.f32 %v170_v43, %v165_v44 }
 0x129   :  { %v174_v47 = vsel %vm169_vm6, %v165_v44, %v172_v45 }
 0x12a   :  { %200 = vmatpush.msra.mxu2 %v174_v47 }
 0x12c   :  { %201 = vmatpush.msra.mxu2 %v173_v49 }
 0x12d   :  { %229 = vmatmul.msk.f32.vlgmr.msra.gmra.mxu2 %vm67_vm0, %v175_v48 }
 0x1b0   :  { %v203_v52 = vpop.f32.mrf.mxu2 }
 0x1b1   :  { %v204_v53 = vadd.f32 %v203_v52, %v182_v51 }
 0x1b3   :  { %206 = vst [vmem:[#allocation5] sm:$0x1] %v204_v53 }
 0x1b4   :  { %217 = dma.vmem_to_hbm [thread:$0]  %s213_s18, 16, %s215_s19, [#allocation6]  }
 0x1b5   :  { %261 = dma.done.wait [#allocation6], 16  }
 0x1b6   :  { %262 = vsyncadd [#allocation6], 4294967280 }
 0x1b7   :  { %222 = vsyncpa [#allocation6], 1 }

</bundles_post_ra>
